<compile_context>
chip_gen: v7x
topology: tpu7x:2x2x1
jax: 0.10.0
libtpu: 0.0.40
codegen_flags: <defaults>
</compile_context>

<pallas_src>
import functools

import jax
import jax.numpy as jnp
from jax import lax
from jax.experimental import pallas as pl
from jax.experimental.pallas import tpu as pltpu

OUT_DIM = 3
OUT_PAD_ROWS = 8          # sublane-padded output rows (3 real + 5 zero)
H1 = 256
H2 = 128
DEFAULT_BATCH_TILE = 2048  # sweep 2048-4096; 2048 stays under the 16 MiB scoped-VMEM default


def _round_up(x, m):
    return ((x + m - 1) // m) * m


def _elu(h):
    # ELU(alpha=1). exp(min(h,0))-1 keeps the discarded branch finite for large positive h;
    # the ~1e-7 abs error vs expm1 near 0 is far below the bf16-matmul noise floor.
    return jnp.where(h > 0, h, jnp.exp(jnp.minimum(h, 0.0)) - 1.0)


def _him_mlp_kernel(x_ref, w1_ref, b1_ref, w2_ref, b2_ref, w3t_ref, b3t_ref, o_ref,
                    *, elu_dtype):
    """Fused 3-layer MLP. bf16 matmuls with f32 accumulation; transposed narrow output."""
    # In-kernel cast to bf16 (no separate wrapper HBM pass).
    x = x_ref[...].astype(jnp.bfloat16)                                   # (tile, D_pad)

    # Layer 1: Linear(D -> 256) + ELU (bias add in f32; ELU in elu_dtype).
    h1 = jnp.dot(x, w1_ref[...], preferred_element_type=jnp.float32) + b1_ref[...]
    h1 = _elu(h1.astype(elu_dtype))

    # Layer 2: Linear(256 -> 128) + ELU.
    h2 = jnp.dot(h1.astype(jnp.bfloat16), w2_ref[...],
                 preferred_element_type=jnp.float32) + b2_ref[...]
    h2 = _elu(h2.astype(elu_dtype))

    # Layer 3: Linear(128 -> 3), emitted transposed as an (8, tile) lane-dense slab:
    #   out_t[o, b] = sum_k w3t[o, k] * h2[b, k]    (rows 3..7 of w3t/b3t are zero)
    out_t = lax.dot_general(
        w3t_ref[...], h2.astype(jnp.bfloat16),
        dimension_numbers=(((1,), (1,)), ((), ())),
        preferred_element_type=jnp.float32)                               # (8, tile)
    o_ref[...] = out_t + b3t_ref[...]


def prepare_params(params):
    """One-time parameter prep: bf16 weights, f32 biases, 128-padded D, transposed last layer."""
    w1 = params["w1"].astype(jnp.float32)                       # (D, 256)
    d = w1.shape[0]
    d_pad = _round_up(d, 128)
    if d_pad != d:
        w1 = jnp.zeros((d_pad, H1), jnp.float32).at[:d, :].set(w1)
    w1 = w1.astype(jnp.bfloat16)                                # (D_pad, 256)
    b1 = params["b1"].reshape(1, -1).astype(jnp.float32)        # (1, 256)
    w2 = params["w2"].astype(jnp.bfloat16)                      # (256, 128)
    b2 = params["b2"].reshape(1, -1).astype(jnp.float32)        # (1, 128)

    # Last layer transposed & sublane-padded: (128, 3) -> (8, 128); bias (3,) -> (8, 1).
    w3 = params["w3"].astype(jnp.float32)                       # (128, 3)
    b3 = params["b3"].astype(jnp.float32)                       # (3,)
    w3t = jnp.zeros((OUT_PAD_ROWS, H2), jnp.float32).at[:OUT_DIM, :].set(w3.T)
    w3t = w3t.astype(jnp.bfloat16)                              # (8, 128) bf16
    b3t = jnp.zeros((OUT_PAD_ROWS, 1), jnp.float32).at[:OUT_DIM, 0].set(b3)  # (8, 1) f32
    return {"w1": w1, "b1": b1, "w2": w2, "b2": b2, "w3t": w3t, "b3t": b3t}


def _chip_defaults():
    """(elu_dtype, row_align): bf16 ELU only on chips with a bf16 VPU/EUP path (v6e/v7x);
    128-row tile granularity on v5e-class chips (4x128 MXU), 256 on v6e/v7x (2x256 MXU)."""
    try:
        kind = jax.devices()[0].device_kind.lower()
    except Exception:
        return jnp.float32, 256
    if "v6" in kind or "v7" in kind:
        return jnp.bfloat16, 256
    return jnp.float32, 128


def _choose_tile(B, batch_tile, row_align):
    if B <= row_align:
        # Single tile; block dims equal to the full batch are always layout-legal.
        return B
    # Batch exceeds one aligned tile: keep grid >= 2 so v7x's two TensorCores both get work;
    # tile stays a multiple of row_align (itself a multiple of 128 -> lane/sublane legal).
    half = _round_up(-(-B // 2), row_align)
    return min(_round_up(batch_tile, row_align), half)


def _vmem_budget_bytes(tile, d_pad):
    f32, bf16 = 4, 2
    in_bytes = 2 * tile * d_pad * f32                         # double-buffered f32 obs tile
    out_bytes = 2 * OUT_PAD_ROWS * tile * f32                 # double-buffered transposed out tile
    w_bytes = ((d_pad * H1 + H1 * H2 + OUT_PAD_ROWS * H2) * bf16
               + (H1 + H2 + OUT_PAD_ROWS) * f32)              # resident weights (fetched once)
    live = tile * (d_pad * bf16                               # x bf16 copy
                   + H1 * (f32 + bf16)                        # h1 f32 + bf16 copy
                   + H2 * (f32 + bf16))                       # h2 f32 + bf16 copy
    return in_bytes + out_bytes + w_bytes + live


def him_estimator_forward(obs_history, prepared_params, *,
                          batch_tile=DEFAULT_BATCH_TILE, row_align=None, elu_dtype=None):
    """Pallas forward pass.

    Args:
      obs_history: (batch, input_dim) f32 (or bf16) array.
      prepared_params: output of prepare_params().
      batch_tile: max rows per grid step (rounded to the chip's row alignment).
    Returns:
      pred_vel: (batch, 3) float32
    """
    auto_elu, auto_align = _chip_defaults()
    if elu_dtype is None:
        elu_dtype = auto_elu
    if row_align is None:
        row_align = auto_align

    B, D = obs_history.shape
    p = prepared_params
    d_pad = p["w1"].shape[0]

    x = obs_history
    if x.dtype not in (jnp.float32, jnp.bfloat16):
        x = x.astype(jnp.float32)
    if D != d_pad:
        # Only hit when input_dim isn't a 128 multiple; costs one extra HBM pass in that case.
        x = jnp.pad(x, ((0, 0), (0, d_pad - D)))

    tile = _choose_tile(B, batch_tile, row_align)
    grid = (pl.cdiv(B, tile),)   # ragged tail handled by masked boundary blocks (no jnp.pad)

    # Raise the scoped-VMEM limit only when the budget actually needs it; never request
    # v7x's full 64 MiB physical VMEM (cap at 48 MiB for compiler-scratch headroom).
    budget = _vmem_budget_bytes(tile, d_pad) + (4 << 20)
    vmem_limit = None if budget <= (16 << 20) else min(budget, 48 << 20)

    kernel = functools.partial(_him_mlp_kernel, elu_dtype=elu_dtype)

    out_t = pl.pallas_call(
        kernel,
        out_shape=jax.ShapeDtypeStruct((OUT_PAD_ROWS, B), jnp.float32),
        grid_spec=pltpu.PrefetchScalarGridSpec(
            num_scalar_prefetch=0,
            grid=grid,
            in_specs=[
                pl.BlockSpec((tile, d_pad), lambda i: (i, 0)),          # obs tile (streamed)
                pl.BlockSpec((d_pad, H1), lambda i: (0, 0)),            # w1 (resident)
                pl.BlockSpec((1, H1), lambda i: (0, 0)),                # b1
                pl.BlockSpec((H1, H2), lambda i: (0, 0)),               # w2
                pl.BlockSpec((1, H2), lambda i: (0, 0)),                # b2
                pl.BlockSpec((OUT_PAD_ROWS, H2), lambda i: (0, 0)),     # w3 (transposed, padded)
                pl.BlockSpec((OUT_PAD_ROWS, 1), lambda i: (0, 0)),      # b3 (transposed, padded)
            ],
            out_specs=pl.BlockSpec((OUT_PAD_ROWS, tile), lambda i: (0, i)),
        ),
        compiler_params=pltpu.CompilerParams(
            dimension_semantics=("parallel",),   # megacore-shard batch tiles on v7x
            vmem_limit_bytes=vmem_limit,
        ),
    )(x, p["w1"], p["b1"], p["w2"], p["b2"], p["w3t"], p["b3t"])

    # Tiny (3, B) -> (B, 3) transpose; ~16x less readback than slicing a (B, 128) f32 slab.
    return out_t[:OUT_DIM, :].T


def _init_params(key, input_dim):
    """Deterministic init mimicking nn.Linear's U(-1/sqrt(fan_in), 1/sqrt(fan_in))."""
    dims = [(input_dim, H1), (H1, H2), (H2, OUT_DIM)]
    params = {}
    for li, (fan_in, fan_out) in enumerate(dims, start=1):
        key, kw, kb = jax.random.split(key, 3)
        bound = 1.0 / jnp.sqrt(fan_in)
        params[f"w{li}"] = jax.random.uniform(
            kw, (fan_in, fan_out), jnp.float32, minval=-bound, maxval=bound)
        params[f"b{li}"] = jax.random.uniform(
            kb, (fan_out,), jnp.float32, minval=-bound, maxval=bound)
    return params


def _reference_forward(obs, params):
    """Pure-JAX f32 reference of the PyTorch forward."""
    h = obs @ params["w1"] + params["b1"]
    h = jnp.where(h > 0, h, jnp.exp(jnp.minimum(h, 0.0)) - 1.0)
    h = h @ params["w2"] + params["b2"]
    h = jnp.where(h > 0, h, jnp.exp(jnp.minimum(h, 0.0)) - 1.0)
    return h @ params["w3"] + params["b3"]


# TODO(synk): the update() path (MSE loss, Adam step, grad-norm clipping) is training-side
# and not part of the forward pass; it is not implemented as a Pallas kernel here.

if __name__ == "__main__":
    # Small, module-consistent shapes: temporal_steps=8, num_one_step_obs=32 -> input_dim=256.
    temporal_steps = 8
    num_one_step_obs = 32
    input_dim = temporal_steps * num_one_step_obs  # 256

    key = jax.random.PRNGKey(0)
    key, k_obs = jax.random.split(key)
    params = _init_params(key, input_dim)
    prepared = prepare_params(params)   # one-time: bf16 cast + transposed/padded last layer

    # Case 1: small batch (single tile).
    batch = 16
    obs_history = jax.random.normal(k_obs, (batch, input_dim), jnp.float32)
    pred_vel = jax.block_until_ready(him_estimator_forward(obs_history, prepared))
    ref = _reference_forward(obs_history, params)
    assert pred_vel.shape == (batch, OUT_DIM), pred_vel.shape
    assert jnp.allclose(pred_vel, ref, atol=3e-2, rtol=3e-2), (
        float(jnp.max(jnp.abs(pred_vel - ref))))

    # Case 2: larger ragged batch (exercises grid > 1 and the masked boundary tile).
    key, k_obs2 = jax.random.split(key)
    batch2 = 300
    obs2 = jax.random.normal(k_obs2, (batch2, input_dim), jnp.float32)
    pred2 = jax.block_until_ready(him_estimator_forward(obs2, prepared))
    ref2 = _reference_forward(obs2, params)
    assert pred2.shape == (batch2, OUT_DIM), pred2.shape
    assert jnp.allclose(pred2, ref2, atol=3e-2, rtol=3e-2), (
        float(jnp.max(jnp.abs(pred2 - ref2))))

    print("KERNEL_OK")
</pallas_src>

<mosaic_0001>
module attributes {stable_mosaic.version = 11 : i64} {
  func.func @_him_mlp_kernel(%arg0: i32, %arg1: memref<16x256xf32, #tpu.memory_space<vmem>>, %arg2: memref<256x256xbf16, #tpu.memory_space<vmem>>, %arg3: memref<1x256xf32, #tpu.memory_space<vmem>>, %arg4: memref<256x128xbf16, #tpu.memory_space<vmem>>, %arg5: memref<1x128xf32, #tpu.memory_space<vmem>>, %arg6: memref<8x128xbf16, #tpu.memory_space<vmem>>, %arg7: memref<8x1xf32, #tpu.memory_space<vmem>>, %arg8: memref<8x16xf32, #tpu.memory_space<vmem>>) attributes {dimension_semantics = [#tpu.dimension_semantics<parallel>], iteration_bounds = array<i64: 1>, scalar_prefetch = 0 : i64, scratch_operands = 0 : i64, tpu.core_type = #tpu.core_type<tc>, window_params = [{transform_indices = @transform_0, window_bounds = array<i64: 16, 256>}, {pipeline_mode = #tpu.pipeline_mode<synchronous>, transform_indices = @transform_1, window_bounds = array<i64: 256, 256>}, {pipeline_mode = #tpu.pipeline_mode<synchronous>, transform_indices = @transform_2, window_bounds = array<i64: 1, 256>}, {pipeline_mode = #tpu.pipeline_mode<synchronous>, transform_indices = @transform_3, window_bounds = array<i64: 256, 128>}, {pipeline_mode = #tpu.pipeline_mode<synchronous>, transform_indices = @transform_4, window_bounds = array<i64: 1, 128>}, {pipeline_mode = #tpu.pipeline_mode<synchronous>, transform_indices = @transform_5, window_bounds = array<i64: 8, 128>}, {pipeline_mode = #tpu.pipeline_mode<synchronous>, transform_indices = @transform_6, window_bounds = array<i64: 8, 1>}, {transform_indices = @transform_7, window_bounds = array<i64: 8, 16>}]} {
    %c0 = arith.constant 0 : index
    %c0_0 = arith.constant 0 : index
    %0 = vector.load %arg1[%c0, %c0_0] : memref<16x256xf32, #tpu.memory_space<vmem>>, vector<16x256xf32>
    %1 = arith.truncf %0 : vector<16x256xf32> to vector<16x256xbf16>
    %c0_1 = arith.constant 0 : index
    %c0_2 = arith.constant 0 : index
    %2 = vector.load %arg2[%c0_1, %c0_2] : memref<256x256xbf16, #tpu.memory_space<vmem>>, vector<256x256xbf16>
    %cst = arith.constant dense<0.000000e+00> : vector<16x256xf32>
    %3 = tpu.matmul %1, %2, %cst {dimension_numbers = #tpu.dot_dimension_numbers<[1], [0], [0], [1], [0, 0, 1, 1], [], []>} : vector<16x256xbf16>, vector<256x256xbf16>, vector<16x256xf32> -> vector<16x256xf32>
    %c0_3 = arith.constant 0 : index
    %c0_4 = arith.constant 0 : index
    %4 = vector.load %arg3[%c0_3, %c0_4] : memref<1x256xf32, #tpu.memory_space<vmem>>, vector<1x256xf32>
    %5 = vector.broadcast %4 : vector<1x256xf32> to vector<16x256xf32>
    %6 = arith.addf %3, %5 : vector<16x256xf32>
    %cst_5 = arith.constant 0.000000e+00 : f32
    %7 = vector.broadcast %cst_5 : f32 to vector<16x256xf32>
    %8 = arith.cmpf ogt, %6, %7 : vector<16x256xf32>
    %cst_6 = arith.constant 0.000000e+00 : f32
    %9 = vector.broadcast %cst_6 : f32 to vector<16x256xf32>
    %10 = arith.minimumf %6, %9 : vector<16x256xf32>
    %11 = math.exp %10 : vector<16x256xf32>
    %cst_7 = arith.constant 1.000000e+00 : f32
    %12 = vector.broadcast %cst_7 : f32 to vector<16x256xf32>
    %13 = arith.subf %11, %12 : vector<16x256xf32>
    %14 = arith.select %8, %6, %13 : vector<16x256xi1>, vector<16x256xf32>
    %15 = arith.truncf %14 : vector<16x256xf32> to vector<16x256xbf16>
    %c0_8 = arith.constant 0 : index
    %c0_9 = arith.constant 0 : index
    %16 = vector.load %arg4[%c0_8, %c0_9] : memref<256x128xbf16, #tpu.memory_space<vmem>>, vector<256x128xbf16>
    %cst_10 = arith.constant dense<0.000000e+00> : vector<16x128xf32>
    %17 = tpu.matmul %15, %16, %cst_10 {dimension_numbers = #tpu.dot_dimension_numbers<[1], [0], [0], [1], [0, 0, 1, 1], [], []>} : vector<16x256xbf16>, vector<256x128xbf16>, vector<16x128xf32> -> vector<16x128xf32>
    %c0_11 = arith.constant 0 : index
    %c0_12 = arith.constant 0 : index
    %18 = vector.load %arg5[%c0_11, %c0_12] : memref<1x128xf32, #tpu.memory_space<vmem>>, vector<1x128xf32>
    %19 = vector.broadcast %18 : vector<1x128xf32> to vector<16x128xf32>
    %20 = arith.addf %17, %19 : vector<16x128xf32>
    %cst_13 = arith.constant 0.000000e+00 : f32
    %21 = vector.broadcast %cst_13 : f32 to vector<16x128xf32>
    %22 = arith.cmpf ogt, %20, %21 : vector<16x128xf32>
    %cst_14 = arith.constant 0.000000e+00 : f32
    %23 = vector.broadcast %cst_14 : f32 to vector<16x128xf32>
    %24 = arith.minimumf %20, %23 : vector<16x128xf32>
    %25 = math.exp %24 : vector<16x128xf32>
    %cst_15 = arith.constant 1.000000e+00 : f32
    %26 = vector.broadcast %cst_15 : f32 to vector<16x128xf32>
    %27 = arith.subf %25, %26 : vector<16x128xf32>
    %28 = arith.select %22, %20, %27 : vector<16x128xi1>, vector<16x128xf32>
    %c0_16 = arith.constant 0 : index
    %c0_17 = arith.constant 0 : index
    %29 = vector.load %arg6[%c0_16, %c0_17] : memref<8x128xbf16, #tpu.memory_space<vmem>>, vector<8x128xbf16>
    %30 = arith.truncf %28 : vector<16x128xf32> to vector<16x128xbf16>
    %cst_18 = arith.constant dense<0.000000e+00> : vector<8x16xf32>
    %31 = tpu.matmul %29, %30, %cst_18 {dimension_numbers = #tpu.dot_dimension_numbers<[1], [1], [0], [0], [0, 0, 1, 0], [], []>} : vector<8x128xbf16>, vector<16x128xbf16>, vector<8x16xf32> -> vector<8x16xf32>
    %c0_19 = arith.constant 0 : index
    %c0_20 = arith.constant 0 : index
    %32 = vector.load %arg7[%c0_19, %c0_20] : memref<8x1xf32, #tpu.memory_space<vmem>>, vector<8x1xf32>
    %33 = vector.broadcast %32 : vector<8x1xf32> to vector<8x16xf32>
    %34 = arith.addf %31, %33 : vector<8x16xf32>
    %c0_21 = arith.constant 0 : index
    %c0_22 = arith.constant 0 : index
    %35 = vector.load %arg8[%c0_21, %c0_22] : memref<8x16xf32, #tpu.memory_space<vmem>>, vector<8x16xf32>
    tpu.vector_store %arg8[%c0_21, %c0_22], %34 {strides = array<i32>} : memref<8x16xf32, #tpu.memory_space<vmem>>, vector<8x16xf32>,
    return
  }
  func.func @transform_0(%arg0: i32) -> (i32, i32) {
    %c0_i32 = arith.constant 0 : i32
    %c0_i32_0 = arith.constant 0 : i32
    return %arg0, %c0_i32 : i32, i32
  }
  func.func @transform_1(%arg0: i32) -> (i32, i32) {
    %c0_i32 = arith.constant 0 : i32
    %c0_i32_0 = arith.constant 0 : i32
    %c0_i32_1 = arith.constant 0 : i32
    return %c0_i32, %c0_i32_0 : i32, i32
  }
  func.func @transform_2(%arg0: i32) -> (i32, i32) {
    %c0_i32 = arith.constant 0 : i32
    %c0_i32_0 = arith.constant 0 : i32
    %c0_i32_1 = arith.constant 0 : i32
    return %c0_i32, %c0_i32_0 : i32, i32
  }
  func.func @transform_3(%arg0: i32) -> (i32, i32) {
    %c0_i32 = arith.constant 0 : i32
    %c0_i32_0 = arith.constant 0 : i32
    %c0_i32_1 = arith.constant 0 : i32
    return %c0_i32, %c0_i32_0 : i32, i32
  }
  func.func @transform_4(%arg0: i32) -> (i32, i32) {
    %c0_i32 = arith.constant 0 : i32
    %c0_i32_0 = arith.constant 0 : i32
    %c0_i32_1 = arith.constant 0 : i32
    return %c0_i32, %c0_i32_0 : i32, i32
  }
  func.func @transform_5(%arg0: i32) -> (i32, i32) {
    %c0_i32 = arith.constant 0 : i32
    %c0_i32_0 = arith.constant 0 : i32
    %c0_i32_1 = arith.constant 0 : i32
    return %c0_i32, %c0_i32_0 : i32, i32
  }
  func.func @transform_6(%arg0: i32) -> (i32, i32) {
    %c0_i32 = arith.constant 0 : i32
    %c0_i32_0 = arith.constant 0 : i32
    %c0_i32_1 = arith.constant 0 : i32
    return %c0_i32, %c0_i32_0 : i32, i32
  }
  func.func @transform_7(%arg0: i32) -> (i32, i32) {
    %c0_i32 = arith.constant 0 : i32
    %c0_i32_0 = arith.constant 0 : i32
    return %c0_i32, %arg0 : i32, i32
  }
}

</mosaic_0001>

<bundles_post_ra>
// kernel: tpu_custom_call.1
= control target key start
LH: loop header
LB: loop body
LE: loop exit
PB: predicated region body
PF: predicated region fallthrough
CT: control target
= control target key end

     0   :  { %12 = vsyncpa [#allocation3], 0  ;;  %s984_s0 = inlined_call_operand.hbm [shape: f32[16,256], index: 0, kind: input, shape index: {}]   ;;  %s985_s1 = inlined_call_operand.hbm [shape: bf16[256,256], index: 1, kind: input, shape index: {}]   ;;  %s986_s2 = inlined_call_operand.vmem [shape: f32[1,256], index: 2, kind: input, shape index: {}]   ;;  %s987_s3 = inlined_call_operand.hbm [shape: bf16[256,128], index: 3, kind: input, shape index: {}]   ;;  %s988_s4 = inlined_call_operand.vmem [shape: f32[1,128], index: 4, kind: input, shape index: {}]   ;;  %s989_s5 = inlined_call_operand.vmem [shape: bf16[8,128], index: 5, kind: input, shape index: {}]   ;;  %s990_s6 = inlined_call_operand.vmem [shape: f32[8,1], index: 6, kind: input, shape index: {}]   ;;  %s991_s7 = inlined_call_operand.hbm [shape: f32[8,16], index: 7, kind: output, shape index: {}]  }
   0x1   :  { %13 = vsyncpa [#allocation6], 0 }
   0x2   :  { %14 = vsyncpa [#allocation4], 0  ;;  %s871_s24 = smov [#allocation5]   ;;  %s777_s28 = scalar_lea.hbm %s985_s1, 4096 }
   0x3   :  { %s32_s25 = sshll.u32 %s871_s24, 4  ;;  %p778_p0 = scmp.ne.s32.totalorder %s985_s1, %s777_s28  ;;  %s33_s25 = int_to_ptr.vmem [resolvable:$true] %s32_s25 }
   0x4   :  { %p781_p1 = scmp.lt.u32.totalorder %s777_s28, %s985_s1 }
   0x6   :  { %p783_p2 = pnand %p781_p1, %p778_p0 }
   0x8   :  { %786 = shalt.err (!%p783_p2)
}
   0x9   :  { %s787_s10 = scalar_lea.vmem %s33_s25, 4096  ;;  %p792_p4 = scmp.lt.s32.totalorder %s33_s25, %s33_s25 }
   0xa   :  { %p788_p3 = scmp.ne.s32.totalorder %s33_s25, %s787_s10  ;;  %p793_p5 = scmp.lt.s32.totalorder %s787_s10, %s787_s10 }
   0xc   :  { %p794_p6 = por %p793_p5, %p792_p4 }
   0xe   :  { %p795_p7 = pnand %p794_p6, %p788_p3 }
  0x10   :  { %798 = shalt.err (!%p795_p7)
}
  0x11   :  { %s872_s11 = smov 128   ;;  %s873_s12 = smov 8  }
  0x12   :  { %38 = dma.hbm_to_vmem [thread:$0]  %s985_s1, 4096, %s33_s25, [#allocation6], %s872_s11, %s872_s11, %s873_s12  }
  0x13   :  { %s874_s15 = smov [#allocation2]   ;;  %s799_s19 = scalar_lea.hbm %s984_s0, 512 }
  0x14   :  { %s20_s16 = sshll.u32 %s874_s15, 4  ;;  %p800_p8 = scmp.ne.s32.totalorder %s984_s0, %s799_s19  ;;  %s21_s16 = int_to_ptr.vmem [resolvable:$true] %s20_s16 }
  0x15   :  { %p803_p9 = scmp.lt.u32.totalorder %s799_s19, %s984_s0 }
  0x17   :  { %p805_p10 = pnand %p803_p9, %p800_p8 }
  0x19   :  { %808 = shalt.err (!%p805_p10)
}
  0x1a   :  { %s809_s24 = scalar_lea.vmem %s21_s16, 512  ;;  %p814_p12 = scmp.lt.s32.totalorder %s21_s16, %s21_s16 }
  0x1b   :  { %p810_p11 = scmp.ne.s32.totalorder %s21_s16, %s809_s24  ;;  %p815_p13 = scmp.lt.s32.totalorder %s809_s24, %s809_s24 }
  0x1d   :  { %p816_p0 = por %p815_p13, %p814_p12 }
  0x1f   :  { %p817_p1 = pnand %p816_p0, %p810_p11 }
  0x21   :  { %820 = shalt.err (!%p817_p1)
}
  0x22   :  { %s875_s1 = smov 256   ;;  %s876_s25 = smov 16  }
  0x23   :  { %26 = dma.hbm_to_vmem [thread:$0]  %s984_s0, 512, %s21_s16, [#allocation3], %s875_s1, %s875_s1, %s876_s25  }
  0x24   :  { %s877_s28 = smov [#allocation7]   ;;  %s821_s9 = scalar_lea.hbm %s987_s3, 2048 }
  0x25   :  { %s46_s29 = sshll.u32 %s877_s28, 4  ;;  %p822_p2 = scmp.ne.s32.totalorder %s987_s3, %s821_s9  ;;  %s47_s29 = int_to_ptr.vmem [resolvable:$true] %s46_s29 }
  0x26   :  { %p825_p3 = scmp.lt.u32.totalorder %s821_s9, %s987_s3 }
  0x28   :  { %p827_p4 = pnand %p825_p3, %p822_p2 }
  0x2a   :  { %830 = shalt.err (!%p827_p4)
}
  0x2b   :  { %s831_s14 = scalar_lea.vmem %s47_s29, 2048  ;;  %p836_p6 = scmp.lt.s32.totalorder %s47_s29, %s47_s29 }
  0x2c   :  { %p832_p5 = scmp.ne.s32.totalorder %s47_s29, %s831_s14  ;;  %p837_p7 = scmp.lt.s32.totalorder %s831_s14, %s831_s14 }
  0x2e   :  { %p838_p8 = por %p837_p7, %p836_p6 }
  0x30   :  { %p839_p9 = pnand %p838_p8, %p832_p5 }
  0x32   :  { %842 = shalt.err (!%p839_p9)
}
  0x33   :  { %s878_s0 = smov 64   ;;  %s879_s15 = smov 4  }
  0x34   :  { %52 = dma.hbm_to_vmem [thread:$0]  %s987_s3, 2048, %s47_s29, [#allocation6], %s878_s0, %s878_s0, %s879_s15  }
  0x35   :  { %865 = dma.done.wait [#allocation3], 512  }
  0x36   :  { %866 = vsyncadd [#allocation3], 4294966784 }
  0x37   :  { %867 = dma.done.wait [#allocation6], 6144  }
  0x38   :  { %868 = vsyncadd [#allocation6], 4294961152  ;;  %v701_v0 = vld [vmem:[#allocation5 + $0x4] ss:$8 sps:$4 sm:$0xff]   ;;  %v703_v1 = vld [vmem:[#allocation5] ss:$8 sps:$4 sm:$0xff]   ;;  %v109_v54 = vlaneseq }
  0x39   :  { %279 = vmatprep.subr.bf16.mxu0 %v701_v0  ;;  %v704_v2 = vld [vmem:[#allocation5 + $0x14] ss:$8 sps:$4 sm:$0xff]   ;;  %v706_v3 = vld [vmem:[#allocation5 + $0x10] ss:$8 sps:$4 sm:$0xff]   ;;  %v707_v4 = vld [vmem:[#allocation5 + $0x24] ss:$8 sps:$4 sm:$0xff]  }
  0x3a   :  { %280 = vmatpush1.bf16.msra.mxu0 %v703_v1  ;;  %v709_v5 = vld [vmem:[#allocation5 + $0x20] ss:$8 sps:$4 sm:$0xff]   ;;  %v710_v6 = vld [vmem:[#allocation5 + $0x34] ss:$8 sps:$4 sm:$0xff]   ;;  %v712_v7 = vld [vmem:[#allocation5 + $0x30] ss:$8 sps:$4 sm:$0xff]  }
  0x3b   :  { %281 = vmatprep.subr.bf16.mxu0 %v704_v2  ;;  %v713_v8 = vld [vmem:[#allocation5 + $0x44] ss:$8 sps:$4 sm:$0xff]   ;;  %v715_v9 = vld [vmem:[#allocation5 + $0x40] ss:$8 sps:$4 sm:$0xff]   ;;  %v716_v10 = vld [vmem:[#allocation5 + $0x54] ss:$8 sps:$4 sm:$0xff]  }
  0x3c   :  { %v718_v11 = vld [vmem:[#allocation5 + $0x50] ss:$8 sps:$4 sm:$0xff]   ;;  %v719_v12 = vld [vmem:[#allocation5 + $0x64] ss:$8 sps:$4 sm:$0xff]   ;;  %v721_v15 = vld [vmem:[#allocation5 + $0x60] ss:$8 sps:$4 sm:$0xff]  }
  0x3d   :  { %v70_v13 = vld [vmem:[#allocation2 + $0x8] sm:$0xff]  ;;  %v72_v14 = vld [vmem:[#allocation2 + $0x18] sm:$0xff]  ;;  %v749_v18 = vld [vmem:[#allocation7 + $0x40] sm:$0xff]   ;;  %v110_v55 = vshrl.u32 %v109_v54, 7  ;;  %vm881_vm4 = vmmov 0   ;;  %s883_s22 = smov [#allocation8]  }
  0x3e   :  { %282 = vmatpush1.bf16.msra.mxu0 %v706_v3  ;;  %v722_v16 = vld [vmem:[#allocation5 + $0x74] ss:$8 sps:$4 sm:$0xff]   ;;  %v74_v17 = vpack.c.bf16 %v72_v14, %v70_v13  ;;  %v750_v19 = vld [vmem:[#allocation7] sm:$0xff]   ;;  %v724_v20 = vld [vmem:[#allocation5 + $0x70] ss:$8 sps:$4 sm:$0xff]   ;;  %657 = vmatprep.subr.bf16.mxu1 %v749_v18  ;;  %s592_s23 = sshll.u32 %s883_s22, 4  ;;  %s593_s23 = int_to_ptr.vmem [resolvable:$true] %s592_s23 }
  0x3f   :  { %283 = vmatprep.subr.bf16.mxu0 %v707_v4  ;;  %v751_v21 = vld [vmem:[#allocation7 + $0x48] sm:$0xff]   ;;  %658 = vmatpush3.bf16.msra.mxu1 %v750_v19  ;;  %v728_v24 = vld [vmem:[#allocation5 + $0x94] ss:$8 sps:$4 sm:$0xff]   ;;  %v730_v25 = vld [vmem:[#allocation5 + $0x90] ss:$8 sps:$4 sm:$0xff]   ;;  %v111_v56 = vsub.s32 0, %v110_v55  ;;  %p848_p11 = scmp.lt.s32.totalorder %s593_s23, %s593_s23 }
  0x40   :  { %311 = vmatprep.mubr.bf16.mxu0 %v74_v17  ;;  %v725_v22 = vld [vmem:[#allocation5 + $0x84] ss:$8 sps:$4 sm:$0xff]   ;;  %659 = vmatprep.subr.bf16.mxu1 %v751_v21  ;;  %v727_v23 = vld [vmem:[#allocation5 + $0x80] ss:$8 sps:$4 sm:$0xff]   ;;  %v734_v28 = vld [vmem:[#allocation5 + $0xb4] ss:$8 sps:$4 sm:$0xff]  }
  0x41   :  { %v731_v26 = vld [vmem:[#allocation5 + $0xa4] ss:$8 sps:$4 sm:$0xff]   ;;  %v733_v27 = vld [vmem:[#allocation5 + $0xa0] ss:$8 sps:$4 sm:$0xff]   ;;  %v736_v29 = vld [vmem:[#allocation5 + $0xb0] ss:$8 sps:$4 sm:$0xff]  }
  0x42   :  { %284 = vmatpush1.bf16.msra.mxu0 %v709_v5  ;;  %v737_v30 = vld [vmem:[#allocation5 + $0xc4] ss:$8 sps:$4 sm:$0xff]   ;;  %v739_v31 = vld [vmem:[#allocation5 + $0xc0] ss:$8 sps:$4 sm:$0xff]   ;;  %v740_v32 = vld [vmem:[#allocation5 + $0xd4] ss:$8 sps:$4 sm:$0xff]  }
  0x43   :  { %285 = vmatprep.subr.bf16.mxu0 %v710_v6  ;;  %v742_v33 = vld [vmem:[#allocation5 + $0xd0] ss:$8 sps:$4 sm:$0xff]   ;;  %v743_v34 = vld [vmem:[#allocation5 + $0xe4] ss:$8 sps:$4 sm:$0xff]   ;;  %v745_v35 = vld [vmem:[#allocation5 + $0xe0] ss:$8 sps:$4 sm:$0xff]  }
  0x44   :  { %v746_v36 = vld [vmem:[#allocation5 + $0xf4] ss:$8 sps:$4 sm:$0xff]   ;;  %v748_v37 = vld [vmem:[#allocation5 + $0xf0] ss:$8 sps:$4 sm:$0xff]   ;;  %v69_v38 = vld [vmem:[#allocation2] sm:$0xff]  ;;  %v115_v58 = vsub.s32 1, %v110_v55 }
  0x45   :  { %v71_v39 = vld [vmem:[#allocation2 + $0x10] sm:$0xff]  ;;  %v752_v41 = vld [vmem:[#allocation7 + $0x8] sm:$0xff]   ;;  %v755_v44 = vld [vmem:[#allocation7 + $0x58] sm:$0xff]   ;;  %vm584_vm7 = vcmask 130048   ;;  %s843_s24 = scalar_lea.vmem %s593_s23, 128 }
  0x46   :  { %286 = vmatpush1.bf16.msra.mxu0 %v712_v7  ;;  %v73_v40 = vpack.c.bf16 %v71_v39, %v69_v38  ;;  %660 = vmatpush3.bf16.msra.mxu1 %v752_v41  ;;  %v753_v42 = vld [vmem:[#allocation7 + $0x50] sm:$0xff]   ;;  %v756_v45 = vld [vmem:[#allocation7 + $0x18] sm:$0xff]   ;;  %v757_v46 = vld [vmem:[#allocation7 + $0x60] sm:$0xff]   ;;  %p844_p10 = scmp.ne.s32.totalorder %s593_s23, %s843_s24  ;;  %p849_p12 = scmp.lt.s32.totalorder %s843_s24, %s843_s24 }
  0x47   :  { %287 = vmatprep.subr.bf16.mxu0 %v713_v8  ;;  %v754_v43 = vld [vmem:[#allocation7 + $0x10] sm:$0xff]   ;;  %661 = vmatprep.subr.bf16.mxu1 %v753_v42  ;;  %v758_v47 = vld [vmem:[#allocation7 + $0x20] sm:$0xff]   ;;  %v759_v48 = vld [vmem:[#allocation7 + $0x68] sm:$0xff]  }
  0x48   :  { %v760_v49 = vld [vmem:[#allocation7 + $0x28] sm:$0xff]   ;;  %v761_v50 = vld [vmem:[#allocation7 + $0x70] sm:$0xff]   ;;  %v763_v52 = vld [vmem:[#allocation7 + $0x78] sm:$0xff]   ;;  %p850_p13 = por %p849_p12, %p848_p11 }
  0x49   :  { %v762_v51 = vld [vmem:[#allocation7 + $0x30] sm:$0xff]   ;;  %v764_v53 = vld [vmem:[#allocation7 + $0x38] sm:$0xff]   ;;  %v107_v57 = vld [vmem:[%s986_s2] sm:$0x3] }
  0x4a   :  { %288 = vmatpush1.bf16.msra.mxu0 %v715_v9  ;;  %662 = vmatpush3.bf16.msra.mxu1 %v754_v43  ;;  %v112_v59 = vrot.slane %v107_v57, %v111_v56  ;;  %v116_v60 = vrot.slane %v107_v57, %v115_v58  ;;  %p851_p0 = pnand %p850_p13, %p844_p10 }
  0x4b   :  { %289 = vmatprep.subr.bf16.mxu0 %v716_v10  ;;  %663 = vmatprep.subr.bf16.mxu1 %v755_v44 }
  0x4e   :  { %290 = vmatpush1.bf16.msra.mxu0 %v718_v11  ;;  %664 = vmatpush3.bf16.msra.mxu1 %v756_v45 }
  0x4f   :  { %291 = vmatprep.subr.bf16.mxu0 %v719_v12  ;;  %665 = vmatprep.subr.bf16.mxu1 %v757_v46 }
  0x52   :  { %292 = vmatpush1.bf16.msra.mxu0 %v721_v15  ;;  %666 = vmatpush3.bf16.msra.mxu1 %v758_v47 }
  0x53   :  { %293 = vmatprep.subr.bf16.mxu0 %v722_v16  ;;  %667 = vmatprep.subr.bf16.mxu1 %v759_v48 }
  0x56   :  { %294 = vmatpush1.bf16.msra.mxu0 %v724_v20  ;;  %668 = vmatpush3.bf16.msra.mxu1 %v760_v49 }
  0x57   :  { %295 = vmatprep.subr.bf16.mxu0 %v725_v22  ;;  %669 = vmatprep.subr.bf16.mxu1 %v761_v50  ;;  %v536_v50 = vld [vmem:[%s989_s5] sm:$0xf] }
  0x5a   :  { %296 = vmatpush1.bf16.msra.mxu0 %v727_v23  ;;  %670 = vmatpush3.bf16.msra.mxu1 %v762_v51 }
  0x5b   :  { %297 = vmatprep.subr.bf16.mxu0 %v728_v24  ;;  %671 = vmatprep.subr.bf16.mxu1 %v763_v52 }
  0x5e   :  { %298 = vmatpush1.bf16.msra.mxu0 %v730_v25  ;;  %672 = vmatpush3.bf16.msra.mxu1 %v764_v53 }
  0x5f   :  { %299 = vmatprep.subr.bf16.mxu0 %v731_v26 }
  0x62   :  { %300 = vmatpush1.bf16.msra.mxu0 %v733_v27  ;;  %v880_v27 = vmov 0.0  }
  0x63   :  { %301 = vmatprep.subr.bf16.mxu0 %v734_v28  ;;  %681 = vmatprep.subr.bf16.mxu1 %v880_v27  ;;  %v538_v28 = vld [vmem:[%s990_s6] sm:$0xff] }
  0x66   :  { %302 = vmatpush1.bf16.msra.mxu0 %v736_v29  ;;  %v882_v29 = vmov 0  }
  0x67   :  { %303 = vmatprep.subr.bf16.mxu0 %v737_v30  ;;  %700 = vset.pattern.permute.xlu0 %v882_v29 }
  0x68   :  { %541 = vperm.xlu0 %700, %v538_v28  }
  0x6a   :  { %304 = vmatpush1.bf16.msra.mxu0 %v739_v31  ;;  %v638_v31 = vld [vmem:[%s988_s4] ss:$0 sm:$0xff] }
  0x6b   :  { %305 = vmatprep.subr.bf16.mxu0 %v740_v32 }
  0x6e   :  { %306 = vmatpush1.bf16.msra.mxu0 %v742_v33 }
  0x6f   :  { %307 = vmatprep.subr.bf16.mxu0 %v743_v34 }
  0x72   :  { %308 = vmatpush1.bf16.msra.mxu0 %v745_v35 }
  0x73   :  { %309 = vmatprep.subr.bf16.mxu0 %v746_v36 }
  0x76   :  { %310 = vmatpush1.bf16.msra.mxu0 %v748_v37 }
  0x79   :  { %312 = vmatmul.mubr.bf16.vlgmr.msra.gmra.mrb[0].mxu0 %v73_v40 }
  0xe7   :  { %v542_v51 = vpop.permute.xlu0 %541 }
 0x14c   :  { %v313_v61 = vpop.f32.mrb[0].mxu0 }
 0x14d   :  { %v314_v62 = vadd.f32 %v313_v61, %v112_v59  ;;  %v315_v63 = vpop.f32.mrb[1].mxu0 }
 0x14e   :  { %v316_v0 = vadd.f32 %v315_v63, %v116_v60  ;;  %v317_v1 = vpop.f32.mrb[2].mxu0 }
 0x14f   :  { %v326_v2 = vmin.f32 %v314_v62, 0.0  ;;  %v318_v3 = vadd.f32 %v317_v1, %v112_v59  ;;  %v319_v4 = vpop.f32.mrb[3].mxu0  ;;  %vm322_vm0 = vcmp.gt.f32.partialorder %v314_v62, 0.0 }
 0x150   :  { %v327_v5 = vmin.f32 %v316_v0, 0.0  ;;  %v320_v6 = vadd.f32 %v319_v4, %v116_v60  ;;  %vm323_vm2 = vcmp.gt.f32.partialorder %v316_v0, 0.0 }
 0x151   :  { %v330_v7 = vmul.f32 1.442695, %v326_v2  ;;  %v328_v8 = vmin.f32 %v318_v3, 0.0  ;;  %vm324_vm1 = vcmp.gt.f32.partialorder %v318_v3, 0.0 }
 0x152   :  { %v332_v9 = vmul.f32 1.442695, %v327_v5  ;;  %v329_v10 = vmin.f32 %v320_v6, 0.0  ;;  %vm325_vm3 = vcmp.gt.f32.partialorder %v320_v6, 0.0 }
 0x153   :  { %765 = vpow2.f32 %v330_v7  ;;  %v334_v11 = vmul.f32 1.442695, %v328_v8 }
 0x154   :  { %767 = vpow2.f32 %v332_v9  ;;  %v336_v12 = vmul.f32 1.442695, %v329_v10 }
 0x155   :  { %769 = vpow2.f32 %v334_v11 }
 0x156   :  { %771 = vpow2.f32 %v336_v12 }
 0x15d   :  { %v766_v13 = vpop.eup %765 }
 0x15e   :  { %v768_v14 = vpop.eup %767  ;;  %v634_v15 = vadd.f32 -1.0, %v766_v13 }
 0x15f   :  { %v770_v16 = vpop.eup %769  ;;  %v635_v17 = vadd.f32 -1.0, %v768_v14 }
 0x160   :  { %v772_v18 = vpop.eup %771  ;;  %v636_v19 = vadd.f32 -1.0, %v770_v16  ;;  %v342_v21 = vsel %vm322_vm0, %v314_v62, %v634_v15 }
 0x161   :  { %v637_v20 = vadd.f32 -1.0, %v772_v18  ;;  %v343_v23 = vsel %vm323_vm2, %v316_v0, %v635_v17 }
 0x162   :  { %v344_v22 = vsel %vm324_vm1, %v318_v3, %v636_v19 }
 0x163   :  { %v345_v24 = vsel %vm325_vm3, %v320_v6, %v637_v20  ;;  %v346_v25 = vpack.c.bf16 %v344_v22, %v342_v21 }
 0x164   :  { %v347_v26 = vpack.c.bf16 %v345_v24, %v343_v23 }
 0x166   :  { %515 = vmatprep.mubr.bf16.mxu1 %v347_v26 }
 0x167   :  { %516 = vmatmul.mubr.bf16.vlgmr.msra.gmra.mrb[0].mxu1 %v346_v25 }
 0x168   :  { %683 = vmatprep.mubr.msk.bf16.mxu1 %vm881_vm4, %v880_v27 }
 0x23a   :  { %v673_v30 = vpop.f32.mrb[0].mxu1 }
 0x23b   :  { %v674_v32 = vpop.f32.mrb[1].mxu1 }
 0x23c   :  { %v675_v33 = vadd.f32 %v674_v32, %v673_v30  ;;  %v676_v34 = vpop.f32.mrb[2].mxu1 }
 0x23d   :  { %v677_v35 = vpop.f32.mrb[3].mxu1 }
 0x23e   :  { %v518_v36 = vadd.f32 %v675_v33, %v638_v31  ;;  %v678_v37 = vadd.f32 %v677_v35, %v676_v34 }
 0x240   :  { %v526_v38 = vmin.f32 %v518_v36, 0.0  ;;  %v521_v39 = vadd.f32 %v678_v37, %v638_v31  ;;  %vm524_vm5 = vcmp.gt.f32.partialorder %v518_v36, 0.0 }
 0x242   :  { %v528_v40 = vmul.f32 1.442695, %v526_v38  ;;  %v527_v41 = vmin.f32 %v521_v39, 0.0  ;;  %vm525_vm6 = vcmp.gt.f32.partialorder %v521_v39, 0.0 }
 0x244   :  { %773 = vpow2.f32 %v528_v40  ;;  %v530_v42 = vmul.f32 1.442695, %v527_v41 }
 0x246   :  { %775 = vpow2.f32 %v530_v42 }
 0x24e   :  { %v774_v43 = vpop.eup %773 }
 0x24f   :  { %v655_v44 = vadd.f32 -1.0, %v774_v43 }
 0x250   :  { %v776_v45 = vpop.eup %775 }
 0x251   :  { %v656_v46 = vadd.f32 -1.0, %v776_v45  ;;  %v534_v47 = vsel %vm524_vm5, %v518_v36, %v655_v44 }
 0x253   :  { %v535_v48 = vsel %vm525_vm6, %v521_v39, %v656_v46 }
 0x254   :  { %v537_v49 = vpack.c.bf16 %v535_v48, %v534_v47 }
 0x256   :  { %682 = vmatpush3.bf16.xpose.msra.mxu1 %v537_v49 }
 0x25d   :  { %684 = vmatmul.mubr.bf16.vlgmr.msra.gmra.mrb[4].mxu1 %v536_v50 }
 0x330   :  { %v578_v52 = vpop.f32.mrb[4].mxu1 }
 0x331   :  { %v579_v53 = vadd.f32 %v578_v52, %v542_v51  ;;  %v685_v54 = vpop.f32.mrb[5].mxu1 }
 0x332   :  { %v581_v55 = vpop.f32.mrb[6].mxu1 }
 0x333   :  { %v686_v56 = vpop.f32.mrb[7].mxu1  ;;  %585 = vst.msk [vmem:[#allocation8] sm:$0xff] %vm584_vm7, %v579_v53 }
 0x334   :  { %854 = shalt.err (!%p851_p0)
}
 0x335   :  { %s855_s25 = scalar_lea.hbm %s991_s7, 128 }
 0x336   :  { %p856_p1 = scmp.ne.s32.totalorder %s991_s7, %s855_s25  ;;  %p859_p2 = scmp.lt.u32.totalorder %s855_s25, %s991_s7 }
 0x338   :  { %p861_p3 = pnand %p859_p2, %p856_p1 }
 0x33a   :  { %864 = shalt.err (!%p861_p3)
}
 0x33b   :  { %595 = dma.vmem_to_hbm [thread:$0]  %s593_s23, 128, %s991_s7, [#allocation4]  }
 0x33c   :  { %869 = dma.done.wait [#allocation4], 128  }
 0x33d   :  { %870 = vsyncadd [#allocation4], 4294967168 }
 0x33e   :  { %599 = vsyncpa [#allocation3], 1 }
 0x33f   :  { %600 = vsyncpa [#allocation6], 1 }
 0x340   :  { %601 = vsyncpa [#allocation4], 1 }

</bundles_post_ra>
